<compile_context>
chip_gen: v7x
topology: tpu7x:2x2x1
jax: 0.10.0
libtpu: 0.0.40
codegen_flags: <defaults>
</compile_context>

<pallas_src>
import functools

import jax
import jax.numpy as jnp
from jax.experimental import pallas as pl
from jax.experimental.pallas import tpu as pltpu


def _tree_sum(terms):
    """Pairwise-tree reduction (shorter dependent add chain than a fold)."""
    terms = list(terms)
    while len(terms) > 1:
        nxt = [terms[i] + terms[i + 1] for i in range(0, len(terms) - 1, 2)]
        if len(terms) % 2:
            nxt.append(terms[-1])
        terms = nxt
    return terms[0]


@functools.lru_cache(maxsize=None)
def _roll_shift_sign():
    """Returns +1 if pltpu.roll follows jnp.roll semantics (out[i] = in[i-shift]),
    -1 if it rotates the other way.  One-off 4 KiB probe kernel."""
    def probe(x_ref, o_ref):
        o_ref[...] = pltpu.roll(x_ref[...], 1, 1)

    x = jnp.broadcast_to(jnp.arange(128, dtype=jnp.float32), (8, 128))
    out = pl.pallas_call(
        probe, out_shape=jax.ShapeDtypeStruct((8, 128), jnp.float32))(x)
    v = float(out[0, 0])
    if v == 127.0:
        return 1
    if v == 1.0:
        return -1
    raise RuntimeError(f"unexpected pltpu.roll behaviour (out[0,0]={v})")


def _gcc_block_kernel(x_ref, pe_ref, tapH_ref, tapW_ref, bconv_ref, mavg_ref,
                      lnw_ref, lnb_ref, w1_ref, b1_ref, w2_ref, b2_ref,
                      gamma_ref, out_ref, *, eps, n_imgs, img_h, img_w, n_ch):
    # x_ref     : (N, H, W*C)  channels-last, lane-dense activations (f32)
    # pe_ref    : (H, W*C)     positional encodings (peH | peW per channel half)
    # tapH_ref  : (H, W*C)     shift-indexed H-conv taps (zero on W-conv channels)
    # tapW_ref  : (W, W*C)     shift-indexed W-conv taps (zero on H-conv channels)
    # bconv_ref : (1, W*C)     depthwise conv biases (bH | bW), tiled over W
    # mavg_ref  : (128, 128)   f32 block-diag 1/C matrix (per-pixel channel mean)
    # lnw/lnb/gamma/b2 : (1, 128)   per-channel vectors tiled over 128//C pixels
    # w1_ref    : (128, 4*128) bf16 blockdiag(pwconv1.weight.T); b1: (1, 4*128)
    # w2_ref    : (4*128, 128) bf16 blockdiag(pwconv2.weight.T)
    H, W, C = img_h, img_w, n_ch
    WC = W * C
    n_grp = WC // 128            # 128-lane column groups per image (whole pixels)
    rows_per_img = n_grp * H     # rows per image in the (*, 128) matmul view
    FAN = 4                      # partial accumulators for the tap sums

    pe = pe_ref[...]
    tap0 = tapH_ref[0] + tapW_ref[0]               # shift-0 taps (shared)
    tapH_rows = [tapH_ref[s] for s in range(1, H)]
    tapW_rows = [tapW_ref[s] for s in range(1, W)]
    bconv = bconv_ref[0]

    xs, conv_parts = [], []
    for n in range(n_imgs):
        x2d = x_ref[n]                             # (H, W*C) raw -> residual
        xs.append(x2d)
        xp = x2d + pe                              # PE only feeds the conv branch

        # Global circular depthwise convs as XLU rolls + VPU scaling, folded
        # into FAN partial accumulators (short dependent add chain).
        accs = [xp * tap0]
        idx = 1
        for s in range(1, H):                      # H-direction: sublane rolls
            t = pltpu.roll(xp, s, 0) * tapH_rows[s - 1]
            if len(accs) < FAN:
                accs.append(t)
            else:
                accs[idx % FAN] = accs[idx % FAN] + t
            idx += 1
        for s in range(1, W):                      # W-direction: lane rolls
            t = pltpu.roll(xp, s * C, 1) * tapW_rows[s - 1]
            if len(accs) < FAN:
                accs.append(t)
            else:
                accs[idx % FAN] = accs[idx % FAN] + t
            idx += 1
        conv = _tree_sum(accs) + bconv             # (H, W*C), f32

        # (H, W*C) -> per-pixel-group (*, 128) view via aligned lane slices +
        # sublane stacking (no minor-dim reshape / relayout).
        conv_parts.extend(conv[:, g * 128:(g + 1) * 128] for g in range(n_grp))

    conv_v = jnp.concatenate(conv_parts, axis=0)   # (N * rows_per_img, 128)
    M = n_imgs * rows_per_img

    # LayerNorm over channels: mean and E[x^2] from ONE matmul against the small
    # block-diagonal 1/C averaging matrix (stats kept in f32).
    stats = jnp.dot(jnp.concatenate([conv_v, conv_v * conv_v], axis=0),
                    mavg_ref[...], preferred_element_type=jnp.float32)
    mu = stats[:M]
    var = stats[M:] - mu * mu
    xn = (conv_v - mu) * jax.lax.rsqrt(var + eps) * lnw_ref[0] + lnb_ref[0]

    # Pointwise MLP: Linear(C->4C) -> exact erf GELU -> Linear(4C->C),
    # bf16 operands on the MXU with f32 accumulation.
    h = jnp.dot(xn.astype(jnp.bfloat16), w1_ref[...],
                preferred_element_type=jnp.float32) + b1_ref[0]
    h = jax.nn.gelu(h, approximate=False)          # nn.GELU() = exact erf GELU
    y = jnp.dot(h.astype(jnp.bfloat16), w2_ref[...],
                preferred_element_type=jnp.float32) + b2_ref[0]
    y = y * gamma_ref[0]                           # layer scale

    # residual add; undo the lane-group stacking and store lane-dense.
    for n in range(n_imgs):
        y_n = y[n * rows_per_img:(n + 1) * rows_per_img]
        y2d = jnp.concatenate(
            [y_n[g * H:(g + 1) * H, :] for g in range(n_grp)], axis=1)
        out_ref[n] = xs[n] + y2d


def gcc_cvx_block(x_nchw, params, *, eps=1e-6):
    """Forward of gcc_cvx_Block. x_nchw: (N, C, H, W) float32 -> same shape."""
    (wH, bH, peH, wW, bW, peW, ln_w, ln_b,
     pw1_w, pw1_b, pw2_w, pw2_b, gamma) = params

    N, C, H, W = x_nchw.shape
    C1 = C // 2
    assert wH.shape == (C1, 1, H, 1) and wW.shape == (C1, 1, 1, W), (
        "instance_kernel_method=None requires H == W == meta_kernel_size")
    WC = W * C
    assert 128 % C == 0 and WC % 128 == 0, "channel count must tile 128 lanes"
    G = 128 // C                 # pixels folded into one 128-lane group
    assert W % G == 0

    # channels-last, lane-dense (N, H, W*C) activation layout (XLA glue).
    x2d = jnp.transpose(x_nchw, (0, 2, 3, 1)).reshape(N, H, WC)

    # PyTorch depthwise weights (c,1,k,1)/(c,1,1,k) -> [tap, channel]
    wH_kc = wH.reshape(C1, H).T
    wW_kc = wW.reshape(C1, W).T
    peH_hc = peH.reshape(C1, H).T            # [h, c]
    peW_wc = peW.reshape(C1, W).T            # [w, c]

    # per-column positional encodings: peH on channels [0,C1), peW on [C1,C)
    pe_full = jnp.concatenate(
        [jnp.broadcast_to(peH_hc[:, None, :], (H, W, C1)),
         jnp.broadcast_to(peW_wc[None, :, :], (H, W, C1))],
        axis=-1).reshape(H, WC)

    # Shift-indexed tap tables for the roll-based circular convs:
    #   conv = sum_s roll(xp, s,  rows) * tapH[s]  +  sum_s roll(xp, s*C, lanes) * tapW[s]
    # With roll shift-sign d (probed), shift s corresponds to tap (-d*s) % K.
    d = _roll_shift_sign()
    tapH_sc = wH_kc[(-d * jnp.arange(H)) % H]          # (H, C1)
    tapW_sc = wW_kc[(-d * jnp.arange(W)) % W]          # (W, C1)
    tapH_full = jnp.concatenate(
        [jnp.broadcast_to(tapH_sc[:, None, :], (H, W, C1)),
         jnp.zeros((H, W, C1), jnp.float32)], axis=-1).reshape(H, WC)
    tapW_full = jnp.concatenate(
        [jnp.zeros((W, W, C1), jnp.float32),
         jnp.broadcast_to(tapW_sc[:, None, :], (W, W, C1))], axis=-1).reshape(W, WC)

    bconv = jnp.tile(jnp.concatenate([bH, bW]), W)[None, :]

    # Small per-128-lane-group (G pixels) operators for LN stats and the MLP.
    mavg_g = jnp.kron(jnp.eye(G, dtype=jnp.float32),
                      jnp.full((C, C), 1.0 / C, jnp.float32))          # (128,128)
    w1_g = jnp.kron(jnp.eye(G, dtype=jnp.float32), pw1_w.T).astype(jnp.bfloat16)
    w2_g = jnp.kron(jnp.eye(G, dtype=jnp.float32), pw2_w.T).astype(jnp.bfloat16)
    lnw_g = jnp.tile(ln_w, G)[None, :]
    lnb_g = jnp.tile(ln_b, G)[None, :]
    gamma_g = jnp.tile(gamma, G)[None, :]
    b1_g = jnp.tile(pw1_b, G)[None, :]
    b2_g = jnp.tile(pw2_b, G)[None, :]

    consts = (pe_full, tapH_full, tapW_full, bconv, mavg_g, lnw_g, lnb_g,
              w1_g, b1_g, w2_g, b2_g, gamma_g)       # ~0.46 MiB total

    def const_spec(a):
        return pl.BlockSpec(a.shape, lambda i, _n=a.ndim: (0,) * _n)

    # One grid step; the whole (small) batch is folded into the matmul M
    # dimension inside the kernel.  For large N, tile the batch over the grid.
    out2d = pl.pallas_call(
        functools.partial(_gcc_block_kernel, eps=eps, n_imgs=N,
                          img_h=H, img_w=W, n_ch=C),
        out_shape=jax.ShapeDtypeStruct((N, H, WC), jnp.float32),
        grid=(1,),
        in_specs=[pl.BlockSpec((N, H, WC), lambda i: (0, 0, 0))]
                 + [const_spec(a) for a in consts],
        out_specs=pl.BlockSpec((N, H, WC), lambda i: (0, 0, 0)),
        compiler_params=pltpu.CompilerParams(
            dimension_semantics=("arbitrary",)),
    )(x2d, *consts)

    return jnp.transpose(out2d.reshape(N, H, W, C), (0, 3, 1, 2))


def init_params(key, dim, H, W, layer_scale_init_value=1.0):
    """Deterministic synthetic parameters with the PyTorch module's shapes."""
    C1 = dim // 2
    ks = jax.random.split(key, 12)
    s = 0.1
    wH = jax.random.normal(ks[0], (C1, 1, H, 1), jnp.float32) * s
    bH = jax.random.normal(ks[1], (C1,), jnp.float32) * s
    peH = jax.random.normal(ks[2], (1, C1, H, 1), jnp.float32) * s
    wW = jax.random.normal(ks[3], (C1, 1, 1, W), jnp.float32) * s
    bW = jax.random.normal(ks[4], (C1,), jnp.float32) * s
    peW = jax.random.normal(ks[5], (1, C1, 1, W), jnp.float32) * s
    ln_w = 1.0 + 0.1 * jax.random.normal(ks[6], (dim,), jnp.float32)
    ln_b = 0.1 * jax.random.normal(ks[7], (dim,), jnp.float32)
    pw1_w = jax.random.normal(ks[8], (4 * dim, dim), jnp.float32) * 0.05
    pw1_b = jax.random.normal(ks[9], (4 * dim,), jnp.float32) * 0.05
    pw2_w = jax.random.normal(ks[10], (dim, 4 * dim), jnp.float32) * 0.05
    pw2_b = jax.random.normal(ks[11], (dim,), jnp.float32) * 0.05
    gamma = layer_scale_init_value * jnp.ones((dim,), jnp.float32)
    return (wH, bH, peH, wW, bW, peW, ln_w, ln_b,
            pw1_w, pw1_b, pw2_w, pw2_b, gamma)


def reference_block(x_nchw, params, *, eps=1e-6):
    """Pure-JAX reference mirroring the PyTorch forward (for validation)."""
    (wH, bH, peH, wW, bW, peW, ln_w, ln_b,
     pw1_w, pw1_b, pw2_w, pw2_b, gamma) = params
    N, C, H, W = x_nchw.shape
    C1 = C // 2
    x1, x2 = x_nchw[:, :C1], x_nchw[:, C1:]

    # gcc_conv_1H: PE add, circular cat along H, depthwise conv with (H,1) kernel
    x1p = x1 + peH
    xc1 = jnp.concatenate([x1p, x1p[:, :, :H - 1, :]], axis=2)
    wH_ck = wH.reshape(C1, H)
    o1 = jnp.zeros_like(x1)
    for k in range(H):
        o1 = o1 + xc1[:, :, k:k + H, :] * wH_ck[:, k][None, :, None, None]
    o1 = o1 + bH[None, :, None, None]

    # gcc_conv_2W: PE add, circular cat along W, depthwise conv with (1,W) kernel
    x2p = x2 + peW
    xc2 = jnp.concatenate([x2p, x2p[:, :, :, :W - 1]], axis=3)
    wW_ck = wW.reshape(C1, W)
    o2 = jnp.zeros_like(x2)
    for k in range(W):
        o2 = o2 + xc2[:, :, :, k:k + W] * wW_ck[:, k][None, :, None, None]
    o2 = o2 + bW[None, :, None, None]

    xcat = jnp.concatenate([o1, o2], axis=1)          # (N, C, H, W)
    xl = jnp.transpose(xcat, (0, 2, 3, 1))            # NHWC
    mu = xl.mean(-1, keepdims=True)
    var = ((xl - mu) ** 2).mean(-1, keepdims=True)
    xn = (xl - mu) / jnp.sqrt(var + eps) * ln_w + ln_b
    h = jnp.einsum('nhwc,dc->nhwd', xn, pw1_w,
                   precision=jax.lax.Precision.HIGHEST) + pw1_b
    h = jax.nn.gelu(h, approximate=False)
    y = jnp.einsum('nhwd,cd->nhwc', h, pw2_w,
                   precision=jax.lax.Precision.HIGHEST) + pw2_b
    y = y * gamma
    return x_nchw + jnp.transpose(y, (0, 3, 1, 2))


if __name__ == "__main__":
    dim, N, H, W = 32, 2, 16, 16          # meta_kernel_size = H = W = 16
    key = jax.random.PRNGKey(0)
    kx, kp = jax.random.split(key)
    x = jax.random.normal(kx, (N, dim, H, W), jnp.float32)
    # layer_scale_init_value=1.0 so the conv/LN/MLP branch actually shows up in
    # the output (the module default 1e-6 would make the check vacuous).
    params = init_params(kp, dim, H, W, layer_scale_init_value=1.0)

    out = jax.block_until_ready(gcc_cvx_block(x, params))
    ref = reference_block(x, params)

    assert out.shape == x.shape and out.dtype == x.dtype
    max_err = float(jnp.max(jnp.abs(out - ref)))
    assert jnp.allclose(out, ref, rtol=2e-2, atol=2e-2), \
        f"max abs err {max_err}"

    print("KERNEL_OK")
</pallas_src>

<mosaic_0001>
module attributes {stable_mosaic.version = 11 : i64} {
  func.func @probe(%arg0: memref<8x128xf32, #tpu.memory_space<vmem>>, %arg1: memref<8x128xf32, #tpu.memory_space<vmem>>) attributes {dimension_semantics = [], scalar_prefetch = 0 : i64, scratch_operands = 0 : i64, tpu.core_type = #tpu.core_type<tc>} {
    %c0 = arith.constant 0 : index
    %c0_0 = arith.constant 0 : index
    %0 = vector.load %arg0[%c0, %c0_0] : memref<8x128xf32, #tpu.memory_space<vmem>>, vector<8x128xf32>
    %c1_i32 = arith.constant 1 : i32
    %1 = tpu.dynamic_rotate %0 by %c1_i32 dim 1 : vector<8x128xf32>, i32 -> vector<8x128xf32>
    %c0_1 = arith.constant 0 : index
    %c0_2 = arith.constant 0 : index
    %2 = vector.load %arg1[%c0_1, %c0_2] : memref<8x128xf32, #tpu.memory_space<vmem>>, vector<8x128xf32>
    tpu.vector_store %arg1[%c0_1, %c0_2], %1 {strides = array<i32>} : memref<8x128xf32, #tpu.memory_space<vmem>>, vector<8x128xf32>,
    return
  }
}

</mosaic_0001>

<bundles_post_ra>
// kernel: tpu_custom_call.1
= control target key start
LH: loop header
LB: loop body
LE: loop exit
PB: predicated region body
PF: predicated region fallthrough
CT: control target
= control target key end

     0   :  { %6 = vsyncpa [#allocation3], 0  ;;  %s128_s0 = inlined_call_operand.hbm [shape: f32[8,128], index: 0, kind: input, shape index: {}]   ;;  %s129_s1 = inlined_call_operand.hbm [shape: f32[8,128], index: 1, kind: output, shape index: {}]  }
   0x1   :  { %7 = vsyncpa [#allocation4], 0  ;;  %s91_s6 = smov [#allocation2]   ;;  %s43_s10 = scalar_lea.hbm %s128_s0, 128 }
   0x2   :  { %s14_s7 = sshll.u32 %s91_s6, 4  ;;  %p44_p0 = scmp.ne.s32.totalorder %s128_s0, %s43_s10  ;;  %s15_s7 = int_to_ptr.vmem [resolvable:$true] %s14_s7 }
   0x3   :  { %p47_p1 = scmp.lt.u32.totalorder %s43_s10, %s128_s0 }
   0x5   :  { %p49_p2 = pnand %p47_p1, %p44_p0 }
   0x7   :  { %52 = shalt.err (!%p49_p2)
}
   0x8   :  { %s53_s15 = scalar_lea.vmem %s15_s7, 128  ;;  %p58_p4 = scmp.lt.s32.totalorder %s15_s7, %s15_s7 }
   0x9   :  { %p54_p3 = scmp.ne.s32.totalorder %s15_s7, %s53_s15  ;;  %p59_p5 = scmp.lt.s32.totalorder %s53_s15, %s53_s15 }
   0xb   :  { %p60_p6 = por %p59_p5, %p58_p4 }
   0xd   :  { %p61_p7 = pnand %p60_p6, %p54_p3 }
   0xf   :  { %64 = shalt.err (!%p61_p7)
}
  0x10   :  { %17 = dma.hbm_to_vmem [thread:$0]  %s128_s0, 128, %s15_s7, [#allocation3]  }
  0x11   :  { %87 = dma.done.wait [#allocation3], 128  }
  0x12   :  { %88 = vsyncadd [#allocation3], 4294967168  ;;  %v21_v0 = vld [vmem:[#allocation2] sm:$0xff]  ;;  %s92_s18 = smov 1   ;;  %s93_s19 = smov [#allocation5]  }
  0x13   :  { %22 = vrot.lane.b32.xlu0 %v21_v0, %s92_s18  ;;  %s31_s20 = sshll.u32 %s93_s19, 4  ;;  %s32_s20 = int_to_ptr.vmem [resolvable:$true] %s31_s20 }
  0x14   :  { %s65_s21 = scalar_lea.vmem %s32_s20, 128  ;;  %p70_p9 = scmp.lt.s32.totalorder %s32_s20, %s32_s20 }
  0x15   :  { %p66_p8 = scmp.ne.s32.totalorder %s32_s20, %s65_s21  ;;  %p71_p10 = scmp.lt.s32.totalorder %s65_s21, %s65_s21 }
  0x17   :  { %p72_p11 = por %p71_p10, %p70_p9 }
  0x19   :  { %p73_p12 = pnand %p72_p11, %p66_p8 }
  0x85   :  { %v23_v1 = vpop.permute.xlu0 %22 }
  0x86   :  { %24 = vst [vmem:[#allocation5] sm:$0xff] %v23_v1 }
  0x87   :  { %76 = shalt.err (!%p73_p12)
}
  0x88   :  { %s77_s0 = scalar_lea.hbm %s129_s1, 128 }
  0x89   :  { %p78_p13 = scmp.ne.s32.totalorder %s129_s1, %s77_s0  ;;  %p81_p0 = scmp.lt.u32.totalorder %s77_s0, %s129_s1 }
  0x8b   :  { %p83_p1 = pnand %p81_p0, %p78_p13 }
  0x8d   :  { %86 = shalt.err (!%p83_p1)
}
  0x8e   :  { %34 = dma.vmem_to_hbm [thread:$0]  %s32_s20, 128, %s129_s1, [#allocation4]  }
  0x8f   :  { %89 = dma.done.wait [#allocation4], 128  }
  0x90   :  { %90 = vsyncadd [#allocation4], 4294967168 }
  0x91   :  { %38 = vsyncpa [#allocation3], 1 }
  0x92   :  { %39 = vsyncpa [#allocation4], 1 }

</bundles_post_ra>
